<compile_context>
chip_gen: v6e
topology: v6e:2x2x1
jax: 0.10.0
libtpu: 0.0.40
codegen_flags: <defaults>
</compile_context>

<pallas_src>
import math

import jax
import jax.numpy as jnp
from jax import lax
from jax.experimental import pallas as pl
from jax.experimental.pallas import tpu as pltpu

_C = 4        # LocallyConnectedLayer hard-codes C=4; LCBlock uses out_sets=4 channels.
_EPS = 1e-5   # BatchNorm1d default


def _cdiv(a, b):
    return -(-a // b)


# ------------------------------ in-kernel helpers ------------------------------
def _silu(x):
    return x * jax.nn.sigmoid(x)


def _lcl_weighted(h, wtile):
    # h: (bt, C, Lin) NCL ; wtile: (C, O, Lin)  ->  (bt, O, Lin)
    # partial[b, o, l] = sum_c h[b, c, l] * W[(l % m) * C + c, o]
    C = h.shape[1]
    acc = h[:, 0:1, :] * wtile[0:1]
    for c in range(1, C):
        acc = acc + h[:, c:c + 1, :] * wtile[c:c + 1]
    return acc


def _lcl(h, wtile, pool):
    # pool: (Lin, n_win) 0/1 window-sum matrix -> (bt, O, n_win).  The ragged last
    # window (F.pad in the PyTorch layer) is handled for free: missing columns simply
    # contribute nothing to the pooled sum.
    partial = _lcl_weighted(h, wtile)
    return lax.dot_general(partial, pool, (((2,), (0,)), ((), ())),
                           preferred_element_type=jnp.float32)


# ----------------------------------- kernels -----------------------------------
def _make_stage1_kernel(pooled):
    # h1 = LCL1(silu(bn(x)))  -- BN applied as precomputed per-channel scale/shift.
    if pooled:
        def kernel(x_ref, s_ref, t_ref, wt_ref, p_ref, o_ref):
            h = x_ref[...] * s_ref[...] + t_ref[...]
            h = _silu(h)
            o_ref[...] = _lcl(h, wt_ref[...], p_ref[...]).astype(o_ref.dtype)
    else:                       # m == 1: n_win == Lin, pooling matrix would be identity
        def kernel(x_ref, s_ref, t_ref, wt_ref, o_ref):
            h = x_ref[...] * s_ref[...] + t_ref[...]
            h = _silu(h)
            o_ref[...] = _lcl_weighted(h, wt_ref[...]).astype(o_ref.dtype)
    return kernel


def _make_stage2_kernel(with_downsample, bt, C, L, L2):
    # out = LCL2(drop(silu(bn(h1)))) + identity_downsample(x)   (dropout p=0.0 == id)
    if with_downsample:
        def kernel(h_ref, x_ref, s_ref, t_ref, wt_ref, p_ref, wlin_ref, blin_ref, o_ref):
            h = h_ref[...] * s_ref[...] + t_ref[...]
            h = _silu(h)
            y = _lcl(h, wt_ref[...], p_ref[...])                      # (bt, O, L2)
            # identity: single un-batched (bt*C, L) x (L, L2) MXU matmul.
            x2 = x_ref[...].reshape(bt * C, L)
            ident = lax.dot_general(x2, wlin_ref[...], (((1,), (0,)), ((), ())),
                                    preferred_element_type=jnp.float32)
            ident = ident.reshape(bt, C, L2) + blin_ref[...]
            o_ref[...] = (y + ident).astype(o_ref.dtype)
    else:                       # m == 1: identity_downsample is None -> add x directly
        def kernel(h_ref, x_ref, s_ref, t_ref, wt_ref, o_ref):
            h = h_ref[...] * s_ref[...] + t_ref[...]
            h = _silu(h)
            y = _lcl_weighted(h, wt_ref[...])
            o_ref[...] = (y + x_ref[...]).astype(o_ref.dtype)
    return kernel


# --------------------------------- wrapper -----------------------------------
def _bn_scale_shift(v, gamma, beta):
    # Training-mode BatchNorm1d statistics: per-channel mean / biased var over (B, L).
    # Precomputed here (tiny reduction) so the Pallas grid can tile over B.
    C = v.shape[1]
    mean = jnp.mean(v, axis=(0, 2))
    var = jnp.mean(jnp.square(v - mean[None, :, None]), axis=(0, 2))
    scale = gamma * lax.rsqrt(var + _EPS)
    shift = beta - mean * scale
    return scale.reshape(1, C, 1), shift.reshape(1, C, 1)


def _lcl_aux(w, lin, m, C, O):
    # Host-side constants for one LocallyConnectedLayer with input length `lin`:
    #   wtile[c, o, l] = w[(l % m) * C + c, o]            (C, O, lin)
    #   pool[l, w]     = 1.0 if l // m == w else 0.0      (lin, ceil(lin / m))
    n_win = _cdiv(lin, m)
    w_r = w.reshape(m, C, O)
    wtile = jnp.transpose(w_r[jnp.arange(lin) % m], (1, 2, 0))
    pool = (jnp.arange(lin)[:, None] // m
            == jnp.arange(n_win)[None, :]).astype(jnp.float32)
    return wtile, pool


def _compiler_params(args, out_bytes):
    est = sum(int(a.size) * a.dtype.itemsize for a in args) + out_bytes
    limit = int(min(32 * 2 ** 20, max(4 * 2 ** 20, 3 * est + (1 << 20))))
    return pltpu.CompilerParams(dimension_semantics=("parallel",),
                                vmem_limit_bytes=limit)


def lc_block_forward(x_ncl, params, m, *, batch_tile=1):
    """LCBlock forward: x (B, 4, in_features) -> (B, 4, ceil(in_features / m**2))."""
    B, C, L = x_ncl.shape
    assert C == _C
    O = _C
    L1 = _cdiv(L, m)
    L2 = _cdiv(L1, m)
    bt = batch_tile
    assert B % bt == 0
    nb = B // bt

    x = x_ncl.astype(jnp.float32)
    gamma = params["bn_gamma"].astype(jnp.float32)
    beta = params["bn_beta"].astype(jnp.float32)
    w1 = params["w1"].reshape(m * C, O).astype(jnp.float32)
    w2 = params["w2"].reshape(m * C, O).astype(jnp.float32)

    wt1, p1 = _lcl_aux(w1, L, m, C, O)      # (C, O, L),  (L, L1)
    wt2, p2 = _lcl_aux(w2, L1, m, C, O)     # (C, O, L1), (L1, L2)

    full = lambda shape: pl.BlockSpec(shape, lambda b: (0,) * len(shape))
    tile = lambda shape: pl.BlockSpec(shape, lambda b: (b,) + (0,) * (len(shape) - 1))

    # ----------------------- stage 1: h1 = LCL1(silu(bn(x))) -----------------------
    s1, t1 = _bn_scale_shift(x, gamma, beta)
    if m != 1:
        args1 = (x, s1, t1, wt1, p1)
        specs1 = [tile((bt, C, L)), full((1, C, 1)), full((1, C, 1)),
                  full((C, O, L)), full((L, L1))]
    else:
        args1 = (x, s1, t1, wt1)
        specs1 = [tile((bt, C, L)), full((1, C, 1)), full((1, C, 1)), full((C, O, L))]

    h1 = pl.pallas_call(
        _make_stage1_kernel(m != 1),
        grid=(nb,),
        out_shape=jax.ShapeDtypeStruct((B, O, L1), jnp.float32),
        in_specs=specs1,
        out_specs=tile((bt, O, L1)),
        compiler_params=_compiler_params(args1, B * O * L1 * 4),
    )(*args1)

    # ----------- stage 2: out = LCL2(silu(bn(h1))) + identity_downsample(x) --------
    # (Same nn.BatchNorm1d module `self.bn` is applied twice -> same gamma/beta.)
    s2, t2 = _bn_scale_shift(h1, gamma, beta)
    if m != 1:
        wlin_t = jnp.transpose(params["lin_w"]).astype(jnp.float32)     # (L, L2)
        blin = params["lin_b"].reshape(1, 1, L2).astype(jnp.float32)
        args2 = (h1, x, s2, t2, wt2, p2, wlin_t, blin)
        specs2 = [tile((bt, O, L1)), tile((bt, C, L)), full((1, C, 1)), full((1, C, 1)),
                  full((C, O, L1)), full((L1, L2)), full((L, L2)), full((1, 1, L2))]
    else:
        args2 = (h1, x, s2, t2, wt2)
        specs2 = [tile((bt, O, L1)), tile((bt, C, L)), full((1, C, 1)), full((1, C, 1)),
                  full((C, O, L1))]

    out = pl.pallas_call(
        _make_stage2_kernel(m != 1, bt, C, L, L2),
        grid=(nb,),
        out_shape=jax.ShapeDtypeStruct((B, O, L2), jnp.float32),
        in_specs=specs2,
        out_specs=tile((bt, O, L2)),
        compiler_params=_compiler_params(args2, B * O * L2 * 4),
    )(*args2)
    return out


# ---------------------------- pure-JAX reference ------------------------------
def _ref_forward(x, params, m):
    C = _C

    def lcl(x_ncl, w):
        ks = m * C
        L = x_ncl.shape[-1]
        pad = (m - L % m) % m * C
        xt = jnp.swapaxes(x_ncl, -1, -2)                 # (B, L, C)
        xf = xt.reshape(xt.shape[0], -1)                 # flatten(1)
        xf = jnp.pad(xf, ((0, 0), (0, pad)))
        xu = xf.reshape(xf.shape[0], -1, ks)             # unfold(size=ks, step=ks)
        y = jnp.matmul(xu, w)                            # w: (1, ks, out_sets)
        return jnp.swapaxes(y, -1, -2)

    def bn(v):
        mean = jnp.mean(v, axis=(0, 2), keepdims=True)
        var = jnp.mean(jnp.square(v - mean), axis=(0, 2), keepdims=True)
        g = params["bn_gamma"].reshape(1, -1, 1)
        b = params["bn_beta"].reshape(1, -1, 1)
        return g * (v - mean) / jnp.sqrt(var + _EPS) + b

    silu = lambda v: v * jax.nn.sigmoid(v)

    identity = x
    h = silu(bn(x))
    h = lcl(h, params["w1"])
    h = silu(bn(h))
    h = lcl(h, params["w2"])
    if m != 1:
        identity = jnp.einsum("bcl,kl->bck", identity, params["lin_w"]) + params["lin_b"]
    return h + identity


# ----------------------------------- main -------------------------------------
def _make_params(key, L, m):
    C = _C
    L2 = _cdiv(_cdiv(L, m), m)
    ks = jax.random.split(key, 6)
    p = dict(
        bn_gamma=jax.random.normal(ks[0], (C,), jnp.float32),
        bn_beta=jax.random.normal(ks[1], (C,), jnp.float32),
        w1=jax.random.normal(ks[2], (1, m * C, C), jnp.float32),   # LCL1.weight
        w2=jax.random.normal(ks[3], (1, m * C, C), jnp.float32),   # LCL2.weight
    )
    if m != 1:
        p["lin_w"] = jax.random.normal(ks[4], (L2, L), jnp.float32) / math.sqrt(L)
        p["lin_b"] = jax.random.normal(ks[5], (L2,), jnp.float32) / math.sqrt(L)
    return p


if __name__ == "__main__":
    key = jax.random.PRNGKey(0)
    cases = [           # (B, in_features L, m)
        (2, 16, 2),     # main case: clean tiling, identity downsample active
        (2, 13, 2),     # ragged: both LCLs exercise the F.pad path
        (2, 8, 1),      # m == 1: no identity downsample
    ]
    for i, (B, L, m) in enumerate(cases):
        kx, kp = jax.random.split(jax.random.fold_in(key, i))
        x = jax.random.normal(kx, (B, _C, L), dtype=jnp.float32)
        params = _make_params(kp, L, m)

        out = jax.block_until_ready(lc_block_forward(x, params, m))
        L2 = _cdiv(_cdiv(L, m), m)
        assert out.shape == (B, _C, L2), (out.shape, (B, _C, L2))

        ref = _ref_forward(x, params, m)
        err = float(jnp.max(jnp.abs(out - ref)))
        assert jnp.allclose(out, ref, atol=2e-4, rtol=2e-4), (B, L, m, err)

    # TODO(synk): BatchNorm running-statistics buffer updates (in-place module state)
    # are not modeled; only the training-mode forward output is reproduced.
    print("KERNEL_OK")
</pallas_src>

<mosaic_0001>
module attributes {stable_mosaic.version = 11 : i64} {
  func.func @kernel(%arg0: i32, %arg1: memref<1x4x16xf32, #tpu.memory_space<vmem>>, %arg2: memref<1x4x1xf32, #tpu.memory_space<vmem>>, %arg3: memref<1x4x1xf32, #tpu.memory_space<vmem>>, %arg4: memref<4x4x16xf32, #tpu.memory_space<vmem>>, %arg5: memref<16x8xf32, #tpu.memory_space<vmem>>, %arg6: memref<1x4x8xf32, #tpu.memory_space<vmem>>) attributes {dimension_semantics = [#tpu.dimension_semantics<parallel>], iteration_bounds = array<i64: 2>, scalar_prefetch = 0 : i64, scratch_operands = 0 : i64, tpu.core_type = #tpu.core_type<tc>, window_params = [{transform_indices = @transform_0, window_bounds = array<i64: 1, 4, 16>}, {pipeline_mode = #tpu.pipeline_mode<synchronous>, transform_indices = @transform_1, window_bounds = array<i64: 1, 4, 1>}, {pipeline_mode = #tpu.pipeline_mode<synchronous>, transform_indices = @transform_2, window_bounds = array<i64: 1, 4, 1>}, {pipeline_mode = #tpu.pipeline_mode<synchronous>, transform_indices = @transform_3, window_bounds = array<i64: 4, 4, 16>}, {pipeline_mode = #tpu.pipeline_mode<synchronous>, transform_indices = @transform_4, window_bounds = array<i64: 16, 8>}, {transform_indices = @transform_5, window_bounds = array<i64: 1, 4, 8>}]} {
    %c0 = arith.constant 0 : index
    %c0_0 = arith.constant 0 : index
    %c0_1 = arith.constant 0 : index
    %0 = vector.load %arg1[%c0, %c0_0, %c0_1] : memref<1x4x16xf32, #tpu.memory_space<vmem>>, vector<1x4x16xf32>
    %c0_2 = arith.constant 0 : index
    %c0_3 = arith.constant 0 : index
    %c0_4 = arith.constant 0 : index
    %1 = vector.load %arg2[%c0_2, %c0_3, %c0_4] : memref<1x4x1xf32, #tpu.memory_space<vmem>>, vector<1x4x1xf32>
    %2 = vector.broadcast %1 : vector<1x4x1xf32> to vector<1x4x16xf32>
    %3 = arith.mulf %0, %2 : vector<1x4x16xf32>
    %c0_5 = arith.constant 0 : index
    %c0_6 = arith.constant 0 : index
    %c0_7 = arith.constant 0 : index
    %4 = vector.load %arg3[%c0_5, %c0_6, %c0_7] : memref<1x4x1xf32, #tpu.memory_space<vmem>>, vector<1x4x1xf32>
    %5 = vector.broadcast %4 : vector<1x4x1xf32> to vector<1x4x16xf32>
    %6 = arith.addf %3, %5 : vector<1x4x16xf32>
    %7 = arith.negf %6 : vector<1x4x16xf32>
    %8 = math.exp %7 : vector<1x4x16xf32>
    %cst = arith.constant 1.000000e+00 : f32
    %9 = vector.broadcast %cst : f32 to vector<1x4x16xf32>
    %10 = arith.addf %9, %8 : vector<1x4x16xf32>
    %11 = arith.divf %9, %10 : vector<1x4x16xf32>
    %12 = arith.mulf %6, %11 : vector<1x4x16xf32>
    %c0_8 = arith.constant 0 : index
    %c0_9 = arith.constant 0 : index
    %c0_10 = arith.constant 0 : index
    %13 = vector.load %arg4[%c0_8, %c0_9, %c0_10] : memref<4x4x16xf32, #tpu.memory_space<vmem>>, vector<4x4x16xf32>
    %c0_11 = arith.constant 0 : index
    %c0_12 = arith.constant 0 : index
    %14 = vector.load %arg5[%c0_11, %c0_12] : memref<16x8xf32, #tpu.memory_space<vmem>>, vector<16x8xf32>
    %15 = vector.extract_strided_slice %12 {offsets = [0, 0, 0], sizes = [1, 1, 16], strides = [1, 1, 1]} : vector<1x4x16xf32> to vector<1x1x16xf32>
    %16 = vector.extract_strided_slice %13 {offsets = [0, 0, 0], sizes = [1, 4, 16], strides = [1, 1, 1]} : vector<4x4x16xf32> to vector<1x4x16xf32>
    %17 = vector.broadcast %15 : vector<1x1x16xf32> to vector<1x4x16xf32>
    %18 = arith.mulf %17, %16 : vector<1x4x16xf32>
    %19 = vector.extract_strided_slice %12 {offsets = [0, 1, 0], sizes = [1, 1, 16], strides = [1, 1, 1]} : vector<1x4x16xf32> to vector<1x1x16xf32>
    %20 = vector.extract_strided_slice %13 {offsets = [1, 0, 0], sizes = [1, 4, 16], strides = [1, 1, 1]} : vector<4x4x16xf32> to vector<1x4x16xf32>
    %21 = vector.broadcast %19 : vector<1x1x16xf32> to vector<1x4x16xf32>
    %22 = arith.mulf %21, %20 : vector<1x4x16xf32>
    %23 = arith.addf %18, %22 : vector<1x4x16xf32>
    %24 = vector.extract_strided_slice %12 {offsets = [0, 2, 0], sizes = [1, 1, 16], strides = [1, 1, 1]} : vector<1x4x16xf32> to vector<1x1x16xf32>
    %25 = vector.extract_strided_slice %13 {offsets = [2, 0, 0], sizes = [1, 4, 16], strides = [1, 1, 1]} : vector<4x4x16xf32> to vector<1x4x16xf32>
    %26 = vector.broadcast %24 : vector<1x1x16xf32> to vector<1x4x16xf32>
    %27 = arith.mulf %26, %25 : vector<1x4x16xf32>
    %28 = arith.addf %23, %27 : vector<1x4x16xf32>
    %29 = vector.extract_strided_slice %12 {offsets = [0, 3, 0], sizes = [1, 1, 16], strides = [1, 1, 1]} : vector<1x4x16xf32> to vector<1x1x16xf32>
    %30 = vector.extract_strided_slice %13 {offsets = [3, 0, 0], sizes = [1, 4, 16], strides = [1, 1, 1]} : vector<4x4x16xf32> to vector<1x4x16xf32>
    %31 = vector.broadcast %29 : vector<1x1x16xf32> to vector<1x4x16xf32>
    %32 = arith.mulf %31, %30 : vector<1x4x16xf32>
    %33 = arith.addf %28, %32 : vector<1x4x16xf32>
    %cst_13 = arith.constant dense<0.000000e+00> : vector<1x4x8xf32>
    %34 = tpu.matmul %33, %14, %cst_13 {dimension_numbers = #tpu.dot_dimension_numbers<[2], [0], [0, 1], [1], [0, 0, 0, 1, 1, 1], [], []>} : vector<1x4x16xf32>, vector<16x8xf32>, vector<1x4x8xf32> -> vector<1x4x8xf32>
    %c0_14 = arith.constant 0 : index
    %c0_15 = arith.constant 0 : index
    %c0_16 = arith.constant 0 : index
    %35 = vector.load %arg6[%c0_14, %c0_15, %c0_16] : memref<1x4x8xf32, #tpu.memory_space<vmem>>, vector<1x4x8xf32>
    tpu.vector_store %arg6[%c0_14, %c0_15, %c0_16], %34 {strides = array<i32>} : memref<1x4x8xf32, #tpu.memory_space<vmem>>, vector<1x4x8xf32>,
    return
  }
  func.func @transform_0(%arg0: i32) -> (i32, i32, i32) {
    %c0_i32 = arith.constant 0 : i32
    %c0_i32_0 = arith.constant 0 : i32
    %c0_i32_1 = arith.constant 0 : i32
    return %arg0, %c0_i32, %c0_i32_0 : i32, i32, i32
  }
  func.func @transform_1(%arg0: i32) -> (i32, i32, i32) {
    %c0_i32 = arith.constant 0 : i32
    %c0_i32_0 = arith.constant 0 : i32
    %c0_i32_1 = arith.constant 0 : i32
    %c0_i32_2 = arith.constant 0 : i32
    return %c0_i32, %c0_i32_0, %c0_i32_1 : i32, i32, i32
  }
  func.func @transform_2(%arg0: i32) -> (i32, i32, i32) {
    %c0_i32 = arith.constant 0 : i32
    %c0_i32_0 = arith.constant 0 : i32
    %c0_i32_1 = arith.constant 0 : i32
    %c0_i32_2 = arith.constant 0 : i32
    return %c0_i32, %c0_i32_0, %c0_i32_1 : i32, i32, i32
  }
  func.func @transform_3(%arg0: i32) -> (i32, i32, i32) {
    %c0_i32 = arith.constant 0 : i32
    %c0_i32_0 = arith.constant 0 : i32
    %c0_i32_1 = arith.constant 0 : i32
    %c0_i32_2 = arith.constant 0 : i32
    return %c0_i32, %c0_i32_0, %c0_i32_1 : i32, i32, i32
  }
  func.func @transform_4(%arg0: i32) -> (i32, i32) {
    %c0_i32 = arith.constant 0 : i32
    %c0_i32_0 = arith.constant 0 : i32
    %c0_i32_1 = arith.constant 0 : i32
    return %c0_i32, %c0_i32_0 : i32, i32
  }
  func.func @transform_5(%arg0: i32) -> (i32, i32, i32) {
    %c0_i32 = arith.constant 0 : i32
    %c0_i32_0 = arith.constant 0 : i32
    %c0_i32_1 = arith.constant 0 : i32
    return %arg0, %c0_i32, %c0_i32_0 : i32, i32, i32
  }
}

</mosaic_0001>

<bundles_post_ra>
// kernel: tpu_custom_call.1
= control target key start
LH: loop header
LB: loop body
LE: loop exit
PB: predicated region body
PF: predicated region fallthrough
CT: control target
= control target key end

     0   :  { %10 = vsyncpa [#allocation3], 0  ;;  %s708_s0 = inlined_call_operand.vmem [shape: f32[2,4,16], index: 0, kind: input, shape index: {}]   ;;  %s709_s1 = inlined_call_operand.vmem [shape: f32[1,4,1], index: 1, kind: input, shape index: {}]   ;;  %s710_s2 = inlined_call_operand.vmem [shape: f32[1,4,1], index: 2, kind: input, shape index: {}]   ;;  %s711_s3 = inlined_call_operand.vmem [shape: f32[4,4,16], index: 3, kind: input, shape index: {}]   ;;  %s712_s4 = inlined_call_operand.vmem [shape: f32[16,8], index: 4, kind: input, shape index: {}]   ;;  %s713_s5 = inlined_call_operand.hbm [shape: f32[2,4,8], index: 5, kind: output, shape index: {}]  }
   0x1   :  { %12 = vsyncpa [#allocation3 + $0x1], 0  ;;  %s585_s18 = smov 0   ;;  %s587_s19 = smov 0  }
   0x2   :  { %s589_s20 = smov 0   ;;  %s591_s21 = smov 0  }
   0x3 LB: > { %s606_s22 = sadd.s32 4294967295, %s549_s21   ;;  %s420_s23 = sadd.s32 4294967294, %s549_s21   ;;  %s549_s21 = sphi %s591_s21, %s719_s21   ;;  %s545_s20 = sphi %s589_s20, %s718_s20   ;;  %s541_s19 = sphi %s587_s19, %s717_s19   ;;  %s537_s18 = sphi %s585_s18, %s716_s18  }
   0x4   : > { %s610_s24 = sadd.s32 1, %s549_s21   ;;  %s135_s25 = sadd.s32 1, %s545_s20 }
   0x5   : > { %s132_s26 = ssub.s32 %s549_s21, %s610_s24  ;;  %p145_p0 = scmp.ne.s32.totalorder %s545_s20, %s541_s19 }
   0x6   : > { %p133_p1 = scmp.eq.s32.totalorder %s132_s26, 0  ;;  %p146_p2 = scmp.eq.s32.totalorder %s606_s22, 1 }
   0x7   : > { %p151_p3 = scmp.ne.s32.totalorder %s541_s19, %s537_s18  ;;  %p152_p4 = scmp.eq.s32.totalorder %s420_s23, 1 }
   0x8   : > { %s621_s27 = scalar_select %p133_p1, %s545_s20, %s135_s25  }
   0x9   : > { %p623_p5 = por %p146_p2, %p145_p0  ;;  %p627_p6 = por %p152_p4, %p151_p3 }
   0xa   : > { %p423_p7 = scmp.ge.s32.totalorder %s549_s21, 1  ;;  %p189_p8 = scmp.lt.s32.totalorder %s549_s21, 3 }
   0xc   : > { %p190_p9 = pnand %p423_p7, %p189_p8 }
   0xd   : > { %p216_p10 = scmp.lt.s32.totalorder (!%p190_p9), %s606_s22, 1  ;;  %s213_s10 = sand.u32 (!%p190_p9), 1, %s541_s19  }
   0xe   : > { %193 = sbr.rel (%p190_p9) target bundleno = 402 (0x192), region = 40  ;;  %s424_s11 = sshll.u32 (!%p190_p9), %s213_s10, 2 }
   0xf   : > { %s429_s12 = sshll.u32 (!%p190_p9), %s606_s22, 6  ;;  %s348_s23 = scalar_lea.sflag (!%p190_p9), [#allocation3], %s213_s10 }
  0x13   : > { %v221_v0 = vld [vmem:[%s709_s1] sm:$0xf]  ;;  %v551_v1 = vmov 0   ;;  %v247_v3 = vld [vmem:[%s712_s4 + $0x8] sm:$0xff]  ;;  %v552_v4 = vmov 0.0   ;;  %vm553_vm0 = vmmov 0   ;;  %v248_v14 = vlaneseq }
  0x14   : > { %484 = vset.pattern.permute.xlu0 %v551_v1  ;;  %v228_v2 = vld [vmem:[%s710_s2] sm:$0xf]  ;;  %435 = vmatprep.subr.mxu0 %v552_v4  ;;  %s217_s13 = scalar_select %p216_p10, %s606_s22, 1  ;;  %v243_v23 = vld [vmem:[%s711_s3 + $0x4] sm:$0xf]  ;;  %vm271_vm1 = vcmask 130048  }
  0x15   : > { %224 = vperm.xlu0 %484, %v221_v0   ;;  %v246_v5 = vld [vmem:[%s712_s4] sm:$0xff]  ;;  %439 = vmatprep.mubr.msk.f32.mxu0 %vm553_vm0, %v552_v4  ;;  %v249_v15 = vshrl.u32 %v248_v14, 7  ;;  %v244_v27 = vld [vmem:[%s711_s3 + $0x8] sm:$0xf]  ;;  %v245_v31 = vld [vmem:[%s711_s3 + $0xc] sm:$0xf] }
  0x16   : > { %436 = vmatpush3.msra.mxu0 %v247_v3  ;;  %s425_s14 = sshll.u32 %s217_s13, 2  ;;  %v242_v22 = vld [vmem:[%s711_s3] sm:$0xf]  ;;  %s215_s13 = scalar_lea.vmem [#allocation2], %s424_s11  ;;  %vm345_vm2 = vcmask 60416  }
  0x17   : > { %437 = vmatprep.subr.mxu0 %v552_v4  ;;  %s219_s17 = scalar_lea.vmem %s708_s0, %s425_s14  ;;  %v250_v16 = vsub.s32 0, %v249_v15  ;;  %v255_v17 = vsub.s32 1, %v249_v15  ;;  %v261_v18 = vsub.s32 2, %v249_v15  ;;  %v267_v20 = vsub.s32 3, %v249_v15  ;;  %s361_s14 = sshll.u32 %s215_s13, 4  ;;  %s669_s14 = int_to_ptr.vmem [resolvable:$true] %s361_s14 }
  0x18   : > { %438 = vmatpush3.msra.mxu0 %v246_v5  ;;  %v220_v7 = vld [vmem:[%s219_s17] sm:$0xf]  ;;  %s667_s17 = scalar_lea.hbm %s713_s5, %s429_s12  ;;  %s489_s25 = scalar_lea.vmem %s669_s14, 64 }
  0x19   : > { %231 = vperm.xlu0 %484, %v228_v2   ;;  %p490_p11 = scmp.ne.s32.totalorder %s669_s14, %s489_s25  ;;  %s554_s22 = smov [#allocation2]  }
  0x1a   : > { %s493_s26 = sshll.u32 %s554_s22, 4  ;;  %s494_s26 = int_to_ptr.vmem [resolvable:$false] %s493_s26 }
  0x1b   : > { %p491_p12 = pnand %p490_p11, %p623_p5  ;;  %s495_s30 = scalar_lea.vmem %s494_s26, 128 }
  0x1c   : > { %p496_p0 = scmp.lt.s32.totalorder %s669_s14, %s494_s26  ;;  %p497_p1 = scmp.lt.s32.totalorder %s495_s30, %s489_s25 }
  0x1d   : > { %p492_p13 = pneg %p491_p12 }
  0x1e   : > { %p498_p2 = por %p497_p1, %p496_p0 }
  0x20   : > { %p499_p3 = pnand %p498_p2, %p492_p13 }
  0x90   : > { %v225_v6 = vpop.permute.xlu0 %224 }
  0x91   : > { %v227_v8 = vmul.f32 %v225_v6, %v220_v7 }
  0x94   : > { %v232_v9 = vpop.permute.xlu0 %231 }
  0x95   : > { %v234_v10 = vadd.f32 %v232_v9, %v227_v8 }
  0x97   : > { %v426_v11 = vmul.f32 -1.442695, %v234_v10 }
  0x99   : > { %485 = vpow2.f32 %v426_v11 }
  0xa6   : > { %v486_v12 = vpop.eup %485 }
  0xa7   : > { %v238_v13 = vadd.f32 1.0, %v486_v12 }
  0xa9   : > { %487 = vrcp.f32 %v238_v13 }
  0xb6   : > { %v488_v19 = vpop.eup %487 }
  0xb7   : > { %v241_v21 = vmul.f32 %v488_v19, %v234_v10 }
  0xb9   : > { %v251_v24 = vrot.slane %v241_v21, %v250_v16  ;;  %v256_v25 = vrot.slane %v241_v21, %v255_v17  ;;  %v262_v26 = vrot.slane %v241_v21, %v261_v18  ;;  %v268_v30 = vrot.slane %v241_v21, %v267_v20 }
  0xbb   : > { %v252_v28 = vmul.f32 %v251_v24, %v242_v22  ;;  %v257_v29 = vmul.f32 %v256_v25, %v243_v23  ;;  %v263_v33 = vmul.f32 %v262_v26, %v244_v27  ;;  %v269_v35 = vmul.f32 %v268_v30, %v245_v31 }
  0xbd   : > { %v258_v32 = vadd.f32 %v257_v29, %v252_v28 }
  0xbf   : > { %v264_v34 = vadd.f32 %v263_v33, %v258_v32 }
  0xc1   : > { %v270_v36 = vadd.f32 %v269_v35, %v264_v34 }
  0xc3   : > { %440 = vmatmul.mubr.msk.f32.vlgmr.msra.gmra.mxu0 %vm271_vm1, %v270_v36 }
 0x183   : > { %v341_v37 = vpop.f32.mrf.mxu0 }
 0x184   : > { %346 = vst.msk [vmem:[%s215_s13] sm:$0xf] %vm345_vm2, %v341_v37 }
 0x185   : > { %v441_v38 = vpop.f32.mrf.mxu0 }
 0x186   : > { %502 = shalt.err (!%p499_p3)
}
 0x187   : > { %s503_s6 = scalar_lea.hbm %s667_s17, 64  ;;  %s507_s9 = scalar_lea.hbm %s713_s5, 128 }
 0x188   : > { %p504_p4 = scmp.ne.s32.totalorder %s667_s17, %s503_s6  ;;  %p508_p9 = scmp.lt.s32.totalorder %s667_s17, %s713_s5 }
 0x189   : > { %p509_p10 = scmp.lt.s32.totalorder %s507_s9, %s503_s6 }
 0x18a   : > { %p505_p7 = pnand %p504_p4, %p623_p5 }
 0x18b   : > { %p510_p11 = por %p509_p10, %p508_p9 }
 0x18c   : > { %p506_p8 = pneg %p505_p7 }
 0x18e   : > { %p511_p12 = pnand %p510_p11, %p506_p8 }
 0x190   : > { %514 = shalt.err (!%p511_p12)
}
 0x191   : > { %442 = dma.vmem_to_hbm [thread:$0]  (%p623_p5), %s669_s14, 64, %s667_s17, %s348_s23  }
 0x192 PF: > { %p448_p13 = scmp.ge.s32.totalorder %s549_s21, 2  ;;  %s373_s12 = sand.u32 1, %s537_s18  }
 0x193   : > { %s374_s13 = scalar_lea.sflag [#allocation3], %s373_s12 }
 0x194   : > { %p445_p0 = pnand %p448_p13, %p627_p6 }
 0x196   : > { %p446_p1 = pneg %p445_p0 }
 0x198   : > { %532 = dma.done.wait (%p446_p1), %s374_s13, 64  }
 0x199   : > { %534 = vsyncadd (%p446_p1), %s374_s13, 4294967232  ;;  %p15_p2 = scmp.ge.s32.totalorder %s610_s24, 4   ;;  %s716_s18 = smov %s541_s19 }
 0x19a   : > { %s717_s19 = smov %s545_s20  ;;  %s718_s20 = smov %s621_s27 }
 0x19b   : > { %s719_s21 = smov %s610_s24  ;;  %17 = sbr.rel (!%p15_p2) target bundleno = 3 (0x3), region = 75 }
 0x1a0   :  { %379 = vsyncpa [#allocation3], 1 }
 0x1a1   :  { %381 = vsyncpa [#allocation3 + $0x1], 1 }

</bundles_post_ra>
